<compile_context>
chip_gen: v7x
topology: tpu7x:2x2x1
jax: 0.10.0
libtpu: 0.0.40
codegen_flags: <defaults>
</compile_context>

<pallas_src>
import functools

import jax
import jax.numpy as jnp
from jax.experimental import pallas as pl
from jax.experimental.pallas import tpu as pltpu


# ----------------------------------------------------------------------------- helpers

def _round_up(x, m):
    return ((x + m - 1) // m) * m


def _windowed_dft(n_fft, win_length, f_pad):
    """Real-DFT operand with the (periodic) Hamming window folded in.

    Returns (n_fft, 2*f_pad) bfloat16: [window*cos | -window*sin], zero-padded in the
    frequency axis from n_fft//2+1 up to f_pad columns per half.
    """
    n_bins = n_fft // 2 + 1
    # torch.hamming_window default is periodic: 0.54 - 0.46*cos(2*pi*n/N)
    n = jnp.arange(win_length, dtype=jnp.float32)
    w = 0.54 - 0.46 * jnp.cos(2.0 * jnp.pi * n / win_length)
    pad = n_fft - win_length
    lpad = pad // 2
    w = jnp.pad(w, (lpad, pad - lpad))                               # (n_fft,)

    nn = jnp.arange(n_fft, dtype=jnp.float32)[:, None]
    k = jnp.arange(n_bins, dtype=jnp.float32)[None, :]
    ang = 2.0 * jnp.pi * nn * k / float(n_fft)
    cos_w = w[:, None] * jnp.cos(ang)                                # (n_fft, n_bins)
    sin_w = -w[:, None] * jnp.sin(ang)

    pad_cols = f_pad - n_bins
    cos_w = jnp.pad(cos_w, ((0, 0), (0, pad_cols)))
    sin_w = jnp.pad(sin_w, ((0, 0), (0, pad_cols)))
    return jnp.concatenate([cos_w, sin_w], axis=1).astype(jnp.bfloat16)  # (n_fft, 2*f_pad)


def _mel_filterbank(n_fft, mel_bins, sample_rate, f_min, f_max, f_pad, m_pad):
    """HTK triangular mel filterbank, zero-padded to (f_pad, m_pad), bfloat16."""
    n_bins = n_fft // 2 + 1

    def hz_to_mel(f):
        return 2595.0 * jnp.log10(1.0 + f / 700.0)

    def mel_to_hz(m):
        return 700.0 * (jnp.power(10.0, m / 2595.0) - 1.0)

    mel_pts = jnp.linspace(hz_to_mel(jnp.float32(f_min)),
                           hz_to_mel(jnp.float32(f_max)), mel_bins + 2)
    hz_pts = mel_to_hz(mel_pts)                                      # (M+2,)
    fft_freqs = jnp.linspace(0.0, sample_rate / 2.0, n_bins)         # (F,)

    lower = hz_pts[:-2][None, :]
    center = hz_pts[1:-1][None, :]
    upper = hz_pts[2:][None, :]
    f = fft_freqs[:, None]
    up = (f - lower) / jnp.maximum(center - lower, 1e-6)
    down = (upper - f) / jnp.maximum(upper - center, 1e-6)
    fb = jnp.maximum(0.0, jnp.minimum(up, down)).astype(jnp.float32)  # (F, M)
    fb = jnp.pad(fb, ((0, f_pad - n_bins), (0, m_pad - mel_bins)))
    return fb.astype(jnp.bfloat16)


def _fade_envelope(num_frames, fade_in_length, fade_out_length):
    # TODO(synk): F.cross_fade does not exist in PyTorch; cross-fading a signal with
    # itself is modelled as a torchaudio-style fade-in/fade-out envelope over time.
    env = jnp.ones((num_frames,), dtype=jnp.float32)
    fade_in_length = min(fade_in_length, num_frames)
    fade_out_length = min(fade_out_length, num_frames)
    if fade_in_length > 0:
        env = env.at[:fade_in_length].mul(jnp.linspace(0.0, 1.0, fade_in_length))
    if fade_out_length > 0:
        env = env.at[num_frames - fade_out_length:].mul(
            jnp.linspace(1.0, 0.0, fade_out_length))
    return env                                                        # (T,)


# ----------------------------------------------------------------------------- kernel

def audio_kernel(frames_ref, dftw_ref, melfb_ref, wfade_ref, out_ref, *,
                 batch, t_pad, n_frames, f_pad):
    # frames_ref: (B*T_pad, n_fft) bf16, zero rows for padded frames.
    frames = frames_ref[...]
    dftw = dftw_ref[...]                                              # (n_fft, 2*f_pad) bf16

    # Single MXU pass: M = B*T_pad, K = n_fft (128), N = 2*f_pad (lane-dense), f32 acc.
    spec = jnp.dot(frames, dftw, preferred_element_type=jnp.float32)  # (B*T_pad, 2*f_pad)
    re = spec[:, :f_pad]
    im = spec[:, f_pad:]
    mag = jnp.sqrt(re * re + im * im)                                 # (B*T_pad, f_pad) f32

    # Mel projection (MXU, bf16 operands, f32 accumulate).
    mel = jnp.dot(mag.astype(jnp.bfloat16), melfb_ref[...],
                  preferred_element_type=jnp.float32)                 # (B*T_pad, m_pad) f32

    wfade = wfade_ref[...]                                            # (T_pad, m_pad) f32
    inv_t = 1.0 / n_frames

    # Time-validity mask (real frames), generated in-kernel — no DMA, pure VPU.
    m_pad = wfade.shape[1]
    t_idx = jax.lax.broadcasted_iota(jnp.int32, (t_pad, m_pad), 0)
    mask = (t_idx < n_frames).astype(jnp.float32)                     # (T_pad, m_pad)

    # Per-batch fused layer-norm (over time) + fade + mean-pool:
    #   out = sum_t (fade[t]-fbar)/T * mel[t,:] * rsqrt(var + eps)
    # using VPU multiplies + cross-sublane (XLU) reductions; no MXU for the tiny stats.
    for b in range(batch):                                            # static unroll
        mel_b = mel[b * t_pad:(b + 1) * t_pad]                        # (T_pad, m_pad), sublane-aligned
        mean = jnp.sum(mel_b, axis=0, keepdims=True) * inv_t          # padded rows are exact zeros
        centered = (mel_b - mean) * mask                              # centered two-pass variance
        var = jnp.sum(centered * centered, axis=0, keepdims=True) * inv_t
        cpool = jnp.sum(mel_b * wfade, axis=0, keepdims=True)         # (1, m_pad)
        out_ref[b] = cpool * jax.lax.rsqrt(var + 1e-5)                # (1, m_pad)


# ----------------------------------------------------------------------------- wrapper

def audio_processor(audio, *, n_fft, hop_length, win_length, sample_rate,
                    mel_bins, f_min, f_max,
                    normalization_mode="per_channel",
                    int8_mode=False, bf16_mode=False):
    assert normalization_mode == "per_channel"
    assert win_length <= n_fft
    # TODO(synk): int8_mode / bf16_mode input casts are not exercised; the compute path is
    # already bf16-operand / f32-accumulate (and v7x has no int8 MXU path anyway).

    batch, num_samples = audio.shape
    n_bins = n_fft // 2 + 1
    f_pad = _round_up(n_bins, 128)
    m_pad = _round_up(mel_bins, 128)

    # center=True framing (torch.stft default): reflect-pad n_fft//2 on each side, then
    # materialize the (B, T, n_fft) frame matrix at trace time (tiny: ~T*n_fft*4 bytes).
    pad = n_fft // 2
    padded = jnp.pad(audio.astype(jnp.float32), ((0, 0), (pad, pad)), mode="reflect")
    num_frames = num_samples // hop_length + 1
    t_pad = _round_up(num_frames, 8)                                  # sublane multiple

    idx = (jnp.arange(num_frames)[:, None] * hop_length
           + jnp.arange(n_fft)[None, :])                              # (T, n_fft)
    frames = padded[:, idx]                                           # (B, T, n_fft)
    frames = jnp.pad(frames, ((0, 0), (0, t_pad - num_frames), (0, 0)))
    frames = frames.reshape(batch * t_pad, n_fft).astype(jnp.bfloat16)

    dft_w = _windowed_dft(n_fft, win_length, f_pad)                   # (n_fft, 2*f_pad) bf16
    mel_fb = _mel_filterbank(n_fft, mel_bins, sample_rate,
                             f_min, f_max, f_pad, m_pad)              # (f_pad, m_pad) bf16

    fade_len = int(0.1 * sample_rate / hop_length)
    env = _fade_envelope(num_frames, fade_len, fade_len)              # (T,)
    wfade = (env - jnp.mean(env)) / num_frames                        # centered fade / T
    wfade = jnp.pad(wfade, (0, t_pad - num_frames))                   # zeros on padded frames
    wfade_bcast = jnp.broadcast_to(wfade[:, None], (t_pad, m_pad)).astype(jnp.float32)

    kernel = functools.partial(
        audio_kernel, batch=batch, t_pad=t_pad,
        n_frames=num_frames, f_pad=f_pad)

    out = pl.pallas_call(
        kernel,
        out_shape=jax.ShapeDtypeStruct((batch, 1, m_pad), jnp.float32),
        grid=(1,),
        in_specs=[
            pl.BlockSpec((batch * t_pad, n_fft), lambda i: (0, 0)),
            pl.BlockSpec((n_fft, 2 * f_pad), lambda i: (0, 0)),
            pl.BlockSpec((f_pad, m_pad), lambda i: (0, 0)),
            pl.BlockSpec((t_pad, m_pad), lambda i: (0, 0)),
        ],
        out_specs=pl.BlockSpec((batch, 1, m_pad), lambda i: (0, 0, 0)),
        compiler_params=pltpu.CompilerParams(
            dimension_semantics=("arbitrary",)),
    )(frames, dft_w, mel_fb, wfade_bcast)

    # (B, 1, m_pad) -> slice padded mel channels, shape as adaptive_avg_pool1d output.
    return out[:, 0, :mel_bins][..., None]                            # (B, mel_bins, 1)


# ----------------------------------------------------------------------------- main

if __name__ == "__main__":
    # Small, deterministic config.
    n_fft = 128
    hop_length = 32
    win_length = 128
    sample_rate = 1600
    mel_bins = 32
    f_min = 0.0
    f_max = 800.0

    batch = 2
    num_samples = 512

    key = jax.random.PRNGKey(0)
    audio = jax.random.normal(key, (batch, num_samples), dtype=jnp.float32)

    out = audio_processor(
        audio,
        n_fft=n_fft, hop_length=hop_length, win_length=win_length,
        sample_rate=sample_rate, mel_bins=mel_bins, f_min=f_min, f_max=f_max,
    )
    out = jax.block_until_ready(out)
    assert out.shape == (batch, mel_bins, 1), out.shape
    assert bool(jnp.all(jnp.isfinite(out)))
    print("KERNEL_OK")
</pallas_src>

<mosaic_0001>
module attributes {stable_mosaic.version = 11 : i64} {
  func.func @audio_kernel(%arg0: i32, %arg1: memref<48x128xbf16, #tpu.memory_space<vmem>>, %arg2: memref<128x256xbf16, #tpu.memory_space<vmem>>, %arg3: memref<128x128xbf16, #tpu.memory_space<vmem>>, %arg4: memref<24x128xf32, #tpu.memory_space<vmem>>, %arg5: memref<2x1x128xf32, #tpu.memory_space<vmem>>) attributes {dimension_semantics = [#tpu.dimension_semantics<arbitrary>], iteration_bounds = array<i64: 1>, scalar_prefetch = 0 : i64, scratch_operands = 0 : i64, tpu.core_type = #tpu.core_type<tc>, window_params = [{pipeline_mode = #tpu.pipeline_mode<synchronous>, transform_indices = @transform_0, window_bounds = array<i64: 48, 128>}, {pipeline_mode = #tpu.pipeline_mode<synchronous>, transform_indices = @transform_1, window_bounds = array<i64: 128, 256>}, {pipeline_mode = #tpu.pipeline_mode<synchronous>, transform_indices = @transform_2, window_bounds = array<i64: 128, 128>}, {pipeline_mode = #tpu.pipeline_mode<synchronous>, transform_indices = @transform_3, window_bounds = array<i64: 24, 128>}, {pipeline_mode = #tpu.pipeline_mode<synchronous>, transform_indices = @transform_4, window_bounds = array<i64: 2, 1, 128>}]} {
    %c0 = arith.constant 0 : index
    %c0_0 = arith.constant 0 : index
    %0 = vector.load %arg1[%c0, %c0_0] : memref<48x128xbf16, #tpu.memory_space<vmem>>, vector<48x128xbf16>
    %c0_1 = arith.constant 0 : index
    %c0_2 = arith.constant 0 : index
    %1 = vector.load %arg2[%c0_1, %c0_2] : memref<128x256xbf16, #tpu.memory_space<vmem>>, vector<128x256xbf16>
    %cst = arith.constant dense<0.000000e+00> : vector<48x256xf32>
    %2 = tpu.matmul %0, %1, %cst {dimension_numbers = #tpu.dot_dimension_numbers<[1], [0], [0], [1], [0, 0, 1, 1], [], []>} : vector<48x128xbf16>, vector<128x256xbf16>, vector<48x256xf32> -> vector<48x256xf32>
    %3 = vector.extract_strided_slice %2 {offsets = [0, 0], sizes = [48, 128], strides = [1, 1]} : vector<48x256xf32> to vector<48x128xf32>
    %4 = vector.extract_strided_slice %2 {offsets = [0, 128], sizes = [48, 128], strides = [1, 1]} : vector<48x256xf32> to vector<48x128xf32>
    %5 = arith.mulf %3, %3 : vector<48x128xf32>
    %6 = arith.mulf %4, %4 : vector<48x128xf32>
    %7 = arith.addf %5, %6 : vector<48x128xf32>
    %8 = math.sqrt %7 : vector<48x128xf32>
    %9 = arith.truncf %8 : vector<48x128xf32> to vector<48x128xbf16>
    %c0_3 = arith.constant 0 : index
    %c0_4 = arith.constant 0 : index
    %10 = vector.load %arg3[%c0_3, %c0_4] : memref<128x128xbf16, #tpu.memory_space<vmem>>, vector<128x128xbf16>
    %cst_5 = arith.constant dense<0.000000e+00> : vector<48x128xf32>
    %11 = tpu.matmul %9, %10, %cst_5 {dimension_numbers = #tpu.dot_dimension_numbers<[1], [0], [0], [1], [0, 0, 1, 1], [], []>} : vector<48x128xbf16>, vector<128x128xbf16>, vector<48x128xf32> -> vector<48x128xf32>
    %c0_6 = arith.constant 0 : index
    %c0_7 = arith.constant 0 : index
    %12 = vector.load %arg4[%c0_6, %c0_7] : memref<24x128xf32, #tpu.memory_space<vmem>>, vector<24x128xf32>
    %13 = tpu.iota {dimensions = array<i32: 0>} : vector<24x128xi32>
    %c17_i32 = arith.constant 17 : i32
    %14 = vector.broadcast %c17_i32 : i32 to vector<24x128xi32>
    %15 = arith.cmpi slt, %13, %14 : vector<24x128xi32>
    %16 = arith.extui %15 : vector<24x128xi1> to vector<24x128xi32>
    %17 = arith.sitofp %16 : vector<24x128xi32> to vector<24x128xf32>
    %18 = vector.extract_strided_slice %11 {offsets = [0, 0], sizes = [24, 128], strides = [1, 1]} : vector<48x128xf32> to vector<24x128xf32>
    %cst_8 = arith.constant dense<0.000000e+00> : vector<128xf32>
    %19 = vector.multi_reduction <add>, %18, %cst_8 [0] : vector<24x128xf32> to vector<128xf32>
    %20 = vector.shape_cast %19 : vector<128xf32> to vector<1x128xf32>
    %cst_9 = arith.constant 0.0588235296 : f32
    %21 = vector.broadcast %cst_9 : f32 to vector<1x128xf32>
    %22 = arith.mulf %20, %21 : vector<1x128xf32>
    %23 = vector.broadcast %22 : vector<1x128xf32> to vector<24x128xf32>
    %24 = arith.subf %18, %23 : vector<24x128xf32>
    %25 = arith.mulf %24, %17 : vector<24x128xf32>
    %26 = arith.mulf %25, %25 : vector<24x128xf32>
    %cst_10 = arith.constant dense<0.000000e+00> : vector<128xf32>
    %27 = vector.multi_reduction <add>, %26, %cst_10 [0] : vector<24x128xf32> to vector<128xf32>
    %28 = vector.shape_cast %27 : vector<128xf32> to vector<1x128xf32>
    %cst_11 = arith.constant 0.0588235296 : f32
    %29 = vector.broadcast %cst_11 : f32 to vector<1x128xf32>
    %30 = arith.mulf %28, %29 : vector<1x128xf32>
    %31 = arith.mulf %18, %12 : vector<24x128xf32>
    %cst_12 = arith.constant dense<0.000000e+00> : vector<128xf32>
    %32 = vector.multi_reduction <add>, %31, %cst_12 [0] : vector<24x128xf32> to vector<128xf32>
    %33 = vector.shape_cast %32 : vector<128xf32> to vector<1x128xf32>
    %cst_13 = arith.constant 9.99999974E-6 : f32
    %34 = vector.broadcast %cst_13 : f32 to vector<1x128xf32>
    %35 = arith.addf %30, %34 : vector<1x128xf32>
    %36 = math.rsqrt %35 : vector<1x128xf32>
    %37 = arith.mulf %33, %36 : vector<1x128xf32>
    %c0_14 = arith.constant 0 : index
    %c0_15 = arith.constant 0 : index
    %c0_16 = arith.constant 0 : index
    %38 = vector.load %arg5[%c0_14, %c0_15, %c0_16] : memref<2x1x128xf32, #tpu.memory_space<vmem>>, vector<1x1x128xf32>
    %39 = vector.shape_cast %38 : vector<1x1x128xf32> to vector<1x128xf32>
    %40 = vector.shape_cast %37 : vector<1x128xf32> to vector<1x1x128xf32>
    tpu.vector_store %arg5[%c0_14, %c0_15, %c0_16], %40 {strides = array<i32>} : memref<2x1x128xf32, #tpu.memory_space<vmem>>, vector<1x1x128xf32>,
    %41 = vector.extract_strided_slice %11 {offsets = [24, 0], sizes = [24, 128], strides = [1, 1]} : vector<48x128xf32> to vector<24x128xf32>
    %cst_17 = arith.constant dense<0.000000e+00> : vector<128xf32>
    %42 = vector.multi_reduction <add>, %41, %cst_17 [0] : vector<24x128xf32> to vector<128xf32>
    %43 = vector.shape_cast %42 : vector<128xf32> to vector<1x128xf32>
    %cst_18 = arith.constant 0.0588235296 : f32
    %44 = vector.broadcast %cst_18 : f32 to vector<1x128xf32>
    %45 = arith.mulf %43, %44 : vector<1x128xf32>
    %46 = vector.broadcast %45 : vector<1x128xf32> to vector<24x128xf32>
    %47 = arith.subf %41, %46 : vector<24x128xf32>
    %48 = arith.mulf %47, %17 : vector<24x128xf32>
    %49 = arith.mulf %48, %48 : vector<24x128xf32>
    %cst_19 = arith.constant dense<0.000000e+00> : vector<128xf32>
    %50 = vector.multi_reduction <add>, %49, %cst_19 [0] : vector<24x128xf32> to vector<128xf32>
    %51 = vector.shape_cast %50 : vector<128xf32> to vector<1x128xf32>
    %cst_20 = arith.constant 0.0588235296 : f32
    %52 = vector.broadcast %cst_20 : f32 to vector<1x128xf32>
    %53 = arith.mulf %51, %52 : vector<1x128xf32>
    %54 = arith.mulf %41, %12 : vector<24x128xf32>
    %cst_21 = arith.constant dense<0.000000e+00> : vector<128xf32>
    %55 = vector.multi_reduction <add>, %54, %cst_21 [0] : vector<24x128xf32> to vector<128xf32>
    %56 = vector.shape_cast %55 : vector<128xf32> to vector<1x128xf32>
    %cst_22 = arith.constant 9.99999974E-6 : f32
    %57 = vector.broadcast %cst_22 : f32 to vector<1x128xf32>
    %58 = arith.addf %53, %57 : vector<1x128xf32>
    %59 = math.rsqrt %58 : vector<1x128xf32>
    %60 = arith.mulf %56, %59 : vector<1x128xf32>
    %c1 = arith.constant 1 : index
    %c0_23 = arith.constant 0 : index
    %c0_24 = arith.constant 0 : index
    %61 = vector.load %arg5[%c1, %c0_23, %c0_24] : memref<2x1x128xf32, #tpu.memory_space<vmem>>, vector<1x1x128xf32>
    %62 = vector.shape_cast %61 : vector<1x1x128xf32> to vector<1x128xf32>
    %63 = vector.shape_cast %60 : vector<1x128xf32> to vector<1x1x128xf32>
    tpu.vector_store %arg5[%c1, %c0_23, %c0_24], %63 {strides = array<i32>} : memref<2x1x128xf32, #tpu.memory_space<vmem>>, vector<1x1x128xf32>,
    return
  }
  func.func @transform_0(%arg0: i32) -> (i32, i32) {
    %c0_i32 = arith.constant 0 : i32
    %c0_i32_0 = arith.constant 0 : i32
    %c0_i32_1 = arith.constant 0 : i32
    return %c0_i32, %c0_i32_0 : i32, i32
  }
  func.func @transform_1(%arg0: i32) -> (i32, i32) {
    %c0_i32 = arith.constant 0 : i32
    %c0_i32_0 = arith.constant 0 : i32
    %c0_i32_1 = arith.constant 0 : i32
    return %c0_i32, %c0_i32_0 : i32, i32
  }
  func.func @transform_2(%arg0: i32) -> (i32, i32) {
    %c0_i32 = arith.constant 0 : i32
    %c0_i32_0 = arith.constant 0 : i32
    %c0_i32_1 = arith.constant 0 : i32
    return %c0_i32, %c0_i32_0 : i32, i32
  }
  func.func @transform_3(%arg0: i32) -> (i32, i32) {
    %c0_i32 = arith.constant 0 : i32
    %c0_i32_0 = arith.constant 0 : i32
    %c0_i32_1 = arith.constant 0 : i32
    return %c0_i32, %c0_i32_0 : i32, i32
  }
  func.func @transform_4(%arg0: i32) -> (i32, i32, i32) {
    %c0_i32 = arith.constant 0 : i32
    %c0_i32_0 = arith.constant 0 : i32
    %c0_i32_1 = arith.constant 0 : i32
    %c0_i32_2 = arith.constant 0 : i32
    return %c0_i32, %c0_i32_0, %c0_i32_1 : i32, i32, i32
  }
}

</mosaic_0001>

<bundles_post_ra>
// kernel: tpu_custom_call.1
= control target key start
LH: loop header
LB: loop body
LE: loop exit
PB: predicated region body
PF: predicated region fallthrough
CT: control target
= control target key end

     0   :  { %9 = vsyncpa [#allocation3], 0  ;;  %s938_s0 = inlined_call_operand.hbm [shape: bf16[48,128], index: 0, kind: input, shape index: {}]   ;;  %s939_s1 = inlined_call_operand.hbm [shape: bf16[128,256], index: 1, kind: input, shape index: {}]   ;;  %s940_s2 = inlined_call_operand.hbm [shape: bf16[128,128], index: 2, kind: input, shape index: {}]   ;;  %s941_s3 = inlined_call_operand.hbm [shape: f32[24,128], index: 3, kind: input, shape index: {}]   ;;  %s942_s4 = inlined_call_operand.hbm [shape: f32[2,1,128], index: 4, kind: output, shape index: {}]  }
   0x1   :  { %10 = vsyncpa [#allocation6], 0 }
   0x2   :  { %11 = vsyncpa [#allocation9], 0 }
   0x3   :  { %12 = vsyncpa [#allocation4], 0  ;;  %s811_s15 = smov [#allocation5]   ;;  %s693_s19 = scalar_lea.hbm %s939_s1, 2048 }
   0x4   :  { %s30_s16 = sshll.u32 %s811_s15, 4  ;;  %p694_p0 = scmp.ne.s32.totalorder %s939_s1, %s693_s19  ;;  %s31_s16 = int_to_ptr.vmem [resolvable:$true] %s30_s16 }
   0x5   :  { %p697_p1 = scmp.lt.u32.totalorder %s693_s19, %s939_s1 }
   0x7   :  { %p699_p2 = pnand %p697_p1, %p694_p0 }
   0x9   :  { %702 = shalt.err (!%p699_p2)
}
   0xa   :  { %s703_s24 = scalar_lea.vmem %s31_s16, 2048  ;;  %p708_p4 = scmp.lt.s32.totalorder %s31_s16, %s31_s16 }
   0xb   :  { %p704_p3 = scmp.ne.s32.totalorder %s31_s16, %s703_s24  ;;  %p709_p5 = scmp.lt.s32.totalorder %s703_s24, %s703_s24 }
   0xd   :  { %p710_p6 = por %p709_p5, %p708_p4 }
   0xf   :  { %p711_p7 = pnand %p710_p6, %p704_p3 }
  0x11   :  { %714 = shalt.err (!%p711_p7)
}
  0x12   :  { %s812_s25 = smov 128   ;;  %s813_s26 = smov 8  }
  0x13   :  { %36 = dma.hbm_to_vmem [thread:$0]  %s939_s1, 2048, %s31_s16, [#allocation6], %s812_s25, %s812_s25, %s813_s26  }
  0x14   :  { %s814_s29 = smov [#allocation2]   ;;  %s715_s7 = scalar_lea.hbm %s938_s0, 384 }
  0x15   :  { %s18_s30 = sshll.u32 %s814_s29, 4  ;;  %p716_p8 = scmp.ne.s32.totalorder %s938_s0, %s715_s7  ;;  %s19_s30 = int_to_ptr.vmem [resolvable:$true] %s18_s30 }
  0x16   :  { %p719_p9 = scmp.lt.u32.totalorder %s715_s7, %s938_s0 }
  0x18   :  { %p721_p10 = pnand %p719_p9, %p716_p8 }
  0x1a   :  { %724 = shalt.err (!%p721_p10)
}
  0x1b   :  { %s725_s12 = scalar_lea.vmem %s19_s30, 384  ;;  %p730_p12 = scmp.lt.s32.totalorder %s19_s30, %s19_s30 }
  0x1c   :  { %p726_p11 = scmp.ne.s32.totalorder %s19_s30, %s725_s12  ;;  %p731_p13 = scmp.lt.s32.totalorder %s725_s12, %s725_s12 }
  0x1e   :  { %p732_p0 = por %p731_p13, %p730_p12 }
  0x20   :  { %p733_p1 = pnand %p732_p0, %p726_p11 }
  0x22   :  { %736 = shalt.err (!%p733_p1)
}
  0x23   :  { %s815_s1 = smov 64   ;;  %s816_s13 = smov 4  }
  0x24   :  { %24 = dma.hbm_to_vmem [thread:$0]  %s938_s0, 384, %s19_s30, [#allocation3], %s815_s1, %s815_s1, %s816_s13  }
  0x25   :  { %s817_s16 = smov [#allocation7]   ;;  %s818_s18 = smov [#allocation8]  }
  0x26   :  { %s42_s17 = sshll.u32 %s817_s16, 4  ;;  %s54_s19 = sshll.u32 %s818_s18, 4  ;;  %s43_s17 = int_to_ptr.vmem [resolvable:$true] %s42_s17  ;;  %s877_s19 = int_to_ptr.vmem [resolvable:$true] %s54_s19 }
  0x27   :  { %s737_s22 = scalar_lea.hbm %s940_s2, 1024 }
  0x28   :  { %p738_p2 = scmp.ne.s32.totalorder %s940_s2, %s737_s22  ;;  %p741_p3 = scmp.lt.u32.totalorder %s737_s22, %s940_s2 }
  0x2a   :  { %p743_p4 = pnand %p741_p3, %p738_p2 }
  0x2c   :  { %746 = shalt.err (!%p743_p4)
}
  0x2d   :  { %s747_s0 = scalar_lea.vmem %s43_s17, 1024  ;;  %p752_p6 = scmp.lt.s32.totalorder %s43_s17, %s43_s17 }
  0x2e   :  { %p748_p5 = scmp.ne.s32.totalorder %s43_s17, %s747_s0  ;;  %p753_p7 = scmp.lt.s32.totalorder %s747_s0, %s747_s0 }
  0x30   :  { %p754_p8 = por %p753_p7, %p752_p6 }
  0x32   :  { %p755_p9 = pnand %p754_p8, %p748_p5 }
  0x34   :  { %758 = shalt.err (!%p755_p9)
}
  0x35   :  { %48 = dma.hbm_to_vmem [thread:$0]  %s940_s2, 1024, %s43_s17, [#allocation6], %s815_s1, %s815_s1, %s816_s13  }
  0x36   :  { %s759_s7 = scalar_lea.hbm %s941_s3, 384 }
  0x37   :  { %p760_p10 = scmp.ne.s32.totalorder %s941_s3, %s759_s7  ;;  %p763_p11 = scmp.lt.u32.totalorder %s759_s7, %s941_s3 }
  0x39   :  { %p765_p12 = pnand %p763_p11, %p760_p10 }
  0x3b   :  { %768 = shalt.err (!%p765_p12)
}
  0x3c   :  { %s769_s12 = scalar_lea.vmem %s877_s19, 384  ;;  %p774_p0 = scmp.lt.s32.totalorder %s877_s19, %s877_s19 }
  0x3d   :  { %p770_p13 = scmp.ne.s32.totalorder %s877_s19, %s769_s12  ;;  %p775_p1 = scmp.lt.s32.totalorder %s769_s12, %s769_s12 }
  0x3f   :  { %p776_p2 = por %p775_p1, %p774_p0 }
  0x41   :  { %p777_p3 = pnand %p776_p2, %p770_p13 }
  0x43   :  { %780 = shalt.err (!%p777_p3)
}
  0x44   :  { %60 = dma.hbm_to_vmem [thread:$0]  %s941_s3, 384, %s877_s19, [#allocation9], %s812_s25, %s812_s25, %s813_s26  }
  0x45   :  { %803 = dma.done.wait [#allocation3], 384  }
  0x46   :  { %804 = vsyncadd [#allocation3], 4294966912 }
  0x47   :  { %805 = dma.done.wait [#allocation6], 3072  }
  0x48   :  { %806 = vsyncadd [#allocation6], 4294964224 }
  0x49   :  { %807 = dma.done.wait [#allocation9], 384  }
  0x4a   :  { %808 = vsyncadd [#allocation9], 4294966912  ;;  %v819_v0 = vmov 0   ;;  %v820_v1 = vmov 0.0   ;;  %v642_v2 = vld [vmem:[#allocation5 + $0x4] ss:$8 sps:$4 sm:$0xff]  }
  0x4b   :  { %226 = vmatprep.mubr.bf16.mxu0 %v819_v0  ;;  %600 = vmatprep.subr.bf16.mxu1 %v820_v1  ;;  %v644_v3 = vld [vmem:[#allocation5] ss:$8 sps:$4 sm:$0xff]   ;;  %v645_v4 = vld [vmem:[#allocation5 + $0x14] ss:$8 sps:$4 sm:$0xff]   ;;  %v647_v5 = vld [vmem:[#allocation5 + $0x10] ss:$8 sps:$4 sm:$0xff]  }
  0x4c   :  { %194 = vmatprep.subr.bf16.mxu0 %v642_v2  ;;  %v648_v6 = vld [vmem:[#allocation5 + $0x24] ss:$8 sps:$4 sm:$0xff]   ;;  %v650_v7 = vld [vmem:[#allocation5 + $0x20] ss:$8 sps:$4 sm:$0xff]   ;;  %v651_v8 = vld [vmem:[#allocation5 + $0x34] ss:$8 sps:$4 sm:$0xff]  }
  0x4d   :  { %195 = vmatpush1.bf16.msra.mxu0 %v644_v3  ;;  %v653_v9 = vld [vmem:[#allocation5 + $0x30] ss:$8 sps:$4 sm:$0xff]   ;;  %v654_v10 = vld [vmem:[#allocation5 + $0x44] ss:$8 sps:$4 sm:$0xff]   ;;  %v656_v11 = vld [vmem:[#allocation5 + $0x40] ss:$8 sps:$4 sm:$0xff]  }
  0x4e   :  { %196 = vmatprep.subr.bf16.mxu0 %v645_v4  ;;  %v657_v12 = vld [vmem:[#allocation5 + $0x54] ss:$8 sps:$4 sm:$0xff]   ;;  %v669_v13 = vld [vmem:[#allocation7] sm:$0xff]   ;;  %v670_v14 = vld [vmem:[#allocation7 + $0x8] sm:$0xff]   ;;  %vm821_vm0 = vmmov 0   ;;  %s822_s3 = smov [#allocation10]  }
  0x4f   :  { %601 = vmatpush3.bf16.msra.mxu1 %v669_v13  ;;  %v659_v15 = vld [vmem:[#allocation5 + $0x50] ss:$8 sps:$4 sm:$0xff]   ;;  %v660_v16 = vld [vmem:[#allocation5 + $0x64] ss:$8 sps:$4 sm:$0xff]   ;;  %v662_v17 = vld [vmem:[#allocation5 + $0x60] ss:$8 sps:$4 sm:$0xff]   ;;  %616 = vmatprep.mubr.msk.bf16.mxu1 %vm821_vm0, %v820_v1 }
  0x50   :  { %602 = vmatprep.subr.bf16.mxu1 %v820_v1  ;;  %v663_v18 = vld [vmem:[#allocation5 + $0x74] ss:$8 sps:$4 sm:$0xff]   ;;  %v665_v19 = vld [vmem:[#allocation5 + $0x70] ss:$8 sps:$4 sm:$0xff]   ;;  %v666_v20 = vld [vmem:[#allocation2] sm:$0xff]   ;;  %s547_s25 = sshll.u32 %s822_s3, 4  ;;  %s548_s25 = int_to_ptr.vmem [resolvable:$true] %s547_s25 }
  0x51   :  { %197 = vmatpush1.bf16.msra.mxu0 %v647_v5  ;;  %v667_v21 = vld [vmem:[#allocation2 + $0x8] sm:$0xff]   ;;  %v668_v22 = vld [vmem:[#allocation2 + $0x10] sm:$0xff]   ;;  %v673_v25 = vld [vmem:[#allocation7 + $0x20] sm:$0xff]   ;;  %s781_s26 = scalar_lea.vmem %s548_s25, 32  ;;  %p786_p5 = scmp.lt.s32.totalorder %s548_s25, %s548_s25 }
  0x52   :  { %198 = vmatprep.subr.bf16.mxu0 %v648_v6  ;;  %v671_v23 = vld [vmem:[#allocation7 + $0x10] sm:$0xff]   ;;  %v672_v24 = vld [vmem:[#allocation7 + $0x18] sm:$0xff]   ;;  %v674_v26 = vld [vmem:[#allocation7 + $0x28] sm:$0xff]   ;;  %p782_p4 = scmp.ne.s32.totalorder %s548_s25, %s781_s26  ;;  %p787_p6 = scmp.lt.s32.totalorder %s781_s26, %s781_s26 }
  0x53   :  { %603 = vmatpush3.bf16.msra.mxu1 %v670_v14  ;;  %v675_v27 = vld [vmem:[#allocation7 + $0x30] sm:$0xff]   ;;  %v676_v28 = vld [vmem:[#allocation7 + $0x38] sm:$0xff]  }
  0x54   :  { %604 = vmatprep.subr.bf16.mxu1 %v820_v1  ;;  %p788_p7 = por %p787_p6, %p786_p5 }
  0x55   :  { %199 = vmatpush1.bf16.msra.mxu0 %v650_v7 }
  0x56   :  { %200 = vmatprep.subr.bf16.mxu0 %v651_v8  ;;  %p789_p8 = pnand %p788_p7, %p782_p4 }
  0x57   :  { %605 = vmatpush3.bf16.msra.mxu1 %v671_v23 }
  0x58   :  { %606 = vmatprep.subr.bf16.mxu1 %v820_v1 }
  0x59   :  { %201 = vmatpush1.bf16.msra.mxu0 %v653_v9 }
  0x5a   :  { %202 = vmatprep.subr.bf16.mxu0 %v654_v10 }
  0x5b   :  { %607 = vmatpush3.bf16.msra.mxu1 %v672_v24 }
  0x5c   :  { %608 = vmatprep.subr.bf16.mxu1 %v820_v1 }
  0x5d   :  { %203 = vmatpush1.bf16.msra.mxu0 %v656_v11 }
  0x5e   :  { %204 = vmatprep.subr.bf16.mxu0 %v657_v12 }
  0x5f   :  { %609 = vmatpush3.bf16.msra.mxu1 %v673_v25 }
  0x60   :  { %610 = vmatprep.subr.bf16.mxu1 %v820_v1 }
  0x61   :  { %205 = vmatpush1.bf16.msra.mxu0 %v659_v15 }
  0x62   :  { %206 = vmatprep.subr.bf16.mxu0 %v660_v16 }
  0x63   :  { %611 = vmatpush3.bf16.msra.mxu1 %v674_v26 }
  0x64   :  { %612 = vmatprep.subr.bf16.mxu1 %v820_v1 }
  0x65   :  { %207 = vmatpush1.bf16.msra.mxu0 %v662_v17 }
  0x66   :  { %208 = vmatprep.subr.bf16.mxu0 %v663_v18 }
  0x67   :  { %613 = vmatpush3.bf16.msra.mxu1 %v675_v27 }
  0x68   :  { %614 = vmatprep.subr.bf16.mxu1 %v820_v1 }
  0x69   :  { %209 = vmatpush1.bf16.msra.mxu0 %v665_v19 }
  0x6b   :  { %615 = vmatpush3.bf16.msra.mxu1 %v676_v28 }
  0x6c   :  { %227 = vmatmul.mubr.bf16.vlgmr.msra.gmra.mrb[0].mxu0 %v666_v20 }
  0x6d   :  { %236 = vmatprep.mubr.bf16.mxu0 %v819_v0 }
  0x74   :  { %237 = vmatmul.mubr.bf16.gmra.mrb[4].mxu0 %v667_v21 }
  0x75   :  { %246 = vmatprep.mubr.bf16.mxu0 %v819_v0 }
  0x7c   :  { %247 = vmatmul.mubr.bf16.gmra.mrb[8].mxu0 %v668_v22 }
 0x13f   :  { %v228_v29 = vpop.f32.mrb[0].mxu0 }
 0x140   :  { %v257_v30 = vmul.f32 %v228_v29, %v228_v29  ;;  %v230_v31 = vpop.f32.mrb[1].mxu0 }
 0x141   :  { %v263_v32 = vmul.f32 %v230_v31, %v230_v31  ;;  %v232_v33 = vpop.f32.mrb[2].mxu0  ;;  %v442_v31 = vld [vmem:[#allocation8 + $0x8] sm:$0xff] }
 0x142   :  { %v258_v34 = vmul.f32 %v232_v33, %v232_v33  ;;  %v234_v35 = vpop.f32.mrb[3].mxu0 }
 0x143   :  { %v269_v36 = vadd.f32 %v263_v32, %v257_v30  ;;  %v264_v37 = vmul.f32 %v234_v35, %v234_v35  ;;  %v441_v30 = vld [vmem:[#allocation8] sm:$0xff] }
 0x145   :  { %677 = vrsqrt.f32 %v269_v36  ;;  %v270_v38 = vadd.f32 %v264_v37, %v258_v34  ;;  %vm277_vm1 = vcmp.eq.f32.partialorder %v269_v36, inf  ;;  %v280_v60 = vand.u32 2147483648, %v269_v36 }
 0x146   :  { %vm279_vm3 = vcmp.eq.f32.partialorder %v269_v36, 0.0 }
 0x147   :  { %679 = vrsqrt.f32 %v270_v38  ;;  %v238_v39 = vpop.f32.mrb[4].mxu0  ;;  %vm284_vm2 = vcmp.eq.f32.partialorder %v270_v38, inf  ;;  %v287_v0 = vand.u32 2147483648, %v270_v38  ;;  %vm286_vm4 = vcmp.eq.f32.partialorder %v270_v38, 0.0 }
 0x148   :  { %v259_v40 = vmul.f32 %v238_v39, %v238_v39  ;;  %v240_v41 = vpop.f32.mrb[5].mxu0  ;;  %v443_v39 = vld [vmem:[#allocation8 + $0x10] sm:$0xff] }
 0x149   :  { %v265_v42 = vmul.f32 %v240_v41, %v240_v41  ;;  %v242_v43 = vpop.f32.mrb[6].mxu0  ;;  %v444_v41 = vlaneseq }
 0x14a   :  { %v260_v44 = vmul.f32 %v242_v43, %v242_v43  ;;  %v244_v45 = vpop.f32.mrb[7].mxu0 }
 0x14b   :  { %v271_v46 = vadd.f32 %v265_v42, %v259_v40  ;;  %v266_v47 = vmul.f32 %v244_v45, %v244_v45 }
 0x14d   :  { %681 = vrsqrt.f32 %v271_v46  ;;  %v272_v48 = vadd.f32 %v266_v47, %v260_v44  ;;  %vm291_vm5 = vcmp.eq.f32.partialorder %v271_v46, inf  ;;  %v294_v12 = vand.u32 2147483648, %v271_v46 }
 0x14e   :  { %vm293_vm7 = vcmp.eq.f32.partialorder %v271_v46, 0.0 }
 0x14f   :  { %v678_v49 = vpop.eup %677  ;;  %683 = vrsqrt.f32 %v272_v48  ;;  %v248_v50 = vpop.f32.mrb[8].mxu0  ;;  %vm298_vm6 = vcmp.eq.f32.partialorder %v272_v48, inf  ;;  %v301_v13 = vand.u32 2147483648, %v272_v48  ;;  %vm300_vm8 = vcmp.eq.f32.partialorder %v272_v48, 0.0 }
 0x150   :  { %v261_v51 = vmul.f32 %v248_v50, %v248_v50  ;;  %v250_v52 = vpop.f32.mrb[9].mxu0  ;;  %v276_v53 = vmul.f32 %v678_v49, %v269_v36  ;;  %v445_v49 = vshrl.u32 %v444_v41, 7 }
 0x151   :  { %v680_v54 = vpop.eup %679  ;;  %v267_v55 = vmul.f32 %v250_v52, %v250_v52  ;;  %v252_v56 = vpop.f32.mrb[10].mxu0 }
 0x152   :  { %v262_v57 = vmul.f32 %v252_v56, %v252_v56  ;;  %v254_v58 = vpop.f32.mrb[11].mxu0  ;;  %v278_v59 = vsel %vm277_vm1, %v269_v36, %v276_v53  ;;  %v283_v61 = vmul.f32 %v680_v54, %v270_v38  ;;  %v447_v52 = vadd.s32 16, %v445_v49 }
 0x153   :  { %v273_v62 = vadd.f32 %v267_v55, %v261_v51  ;;  %v268_v63 = vmul.f32 %v254_v58, %v254_v58  ;;  %v281_v4 = vsel %vm279_vm3, %v280_v60, %v278_v59 }
 0x154   :  { %v285_v2 = vsel %vm284_vm2, %v270_v38, %v283_v61  ;;  %vm450_vm13 = vcmp.lt.s32.totalorder %v447_v52, 17 }
 0x155   :  { %685 = vrsqrt.f32 %v273_v62  ;;  %v274_v3 = vadd.f32 %v268_v63, %v262_v57  ;;  %v288_v5 = vsel %vm286_vm4, %v287_v0, %v285_v2  ;;  %vm305_vm9 = vcmp.eq.f32.partialorder %v273_v62, inf }
 0x156   :  { %v317_v6 = vpack.c.bf16 %v288_v5, %v281_v4  ;;  %v308_v23 = vand.u32 2147483648, %v273_v62  ;;  %vm307_vm11 = vcmp.eq.f32.partialorder %v273_v62, 0.0 }
 0x157   :  { %v682_v7 = vpop.eup %681  ;;  %687 = vrsqrt.f32 %v274_v3  ;;  %vm312_vm10 = vcmp.eq.f32.partialorder %v274_v3, inf  ;;  %v315_v24 = vand.u32 2147483648, %v274_v3  ;;  %vm314_vm12 = vcmp.eq.f32.partialorder %v274_v3, 0.0 }
 0x158   :  { %617 = vmatmul.mubr.bf16.vlgmr.msra.gmra.mrb[0].mxu1 %v317_v6  ;;  %v290_v8 = vmul.f32 %v682_v7, %v271_v46  ;;  %v588_v7 = vsel %vm450_vm13, 1.0, %v820_v1 }
 0x159   :  { %v684_v9 = vpop.eup %683  ;;  %620 = vmatprep.mubr.msk.bf16.mxu1 %vm821_vm0, %v820_v1 }
 0x15a   :  { %v292_v10 = vsel %vm291_vm5, %v271_v46, %v290_v8  ;;  %v297_v11 = vmul.f32 %v684_v9, %v272_v48 }
 0x15b   :  { %v295_v15 = vsel %vm293_vm7, %v294_v12, %v292_v10 }
 0x15c   :  { %v299_v14 = vsel %vm298_vm6, %v272_v48, %v297_v11 }
 0x15d   :  { %v302_v16 = vsel %vm300_vm8, %v301_v13, %v299_v14 }
 0x15e   :  { %v318_v17 = vpack.c.bf16 %v302_v16, %v295_v15 }
 0x15f   :  { %v686_v18 = vpop.eup %685 }
 0x160   :  { %621 = vmatmul.mubr.bf16.gmra.mrb[4].mxu1 %v318_v17  ;;  %v304_v19 = vmul.f32 %v686_v18, %v273_v62 }
 0x161   :  { %v688_v20 = vpop.eup %687  ;;  %624 = vmatprep.mubr.msk.bf16.mxu1 %vm821_vm0, %v820_v1 }
 0x162   :  { %v306_v21 = vsel %vm305_vm9, %v273_v62, %v304_v19  ;;  %v311_v22 = vmul.f32 %v688_v20, %v274_v3 }
 0x163   :  { %v309_v26 = vsel %vm307_vm11, %v308_v23, %v306_v21 }
 0x164   :  { %v313_v25 = vsel %vm312_vm10, %v274_v3, %v311_v22 }
 0x165   :  { %v316_v27 = vsel %vm314_vm12, %v315_v24, %v313_v25 }
 0x166   :  { %v319_v28 = vpack.c.bf16 %v316_v27, %v309_v26 }
 0x168   :  { %625 = vmatmul.mubr.bf16.gmra.mrb[8].mxu1 %v319_v28 }
 0x22b   :  { %v418_v29 = vpop.f32.mrb[0].mxu1 }
 0x22c   :  { %v618_v32 = vpop.f32.mrb[1].mxu1  ;;  %v484_v34 = vmul.f32 %v441_v30, %v418_v29 }
 0x22d   :  { %v421_v33 = vpop.f32.mrb[2].mxu1 }
 0x22e   :  { %v457_v35 = vadd.f32 %v421_v33, %v418_v29  ;;  %v485_v36 = vmul.f32 %v442_v31, %v421_v33  ;;  %v619_v37 = vpop.f32.mrb[3].mxu1 }
 0x230   :  { %v487_v38 = vadd.f32 %v485_v36, %v484_v34 }
 0x233   :  { %v426_v40 = vpop.f32.mrb[4].mxu1 }
 0x234   :  { %v458_v42 = vadd.f32 %v457_v35, %v426_v40  ;;  %v486_v43 = vmul.f32 %v443_v39, %v426_v40  ;;  %v622_v44 = vpop.f32.mrb[5].mxu1 }
 0x235   :  { %v429_v45 = vpop.f32.mrb[6].mxu1 }
 0x236   :  { %v459_v46 = vrot.slane %v458_v42, 4  ;;  %v488_v47 = vadd.f32 %v487_v38, %v486_v43  ;;  %v623_v48 = vpop.f32.mrb[7].mxu1  ;;  %v526_v55 = vmul.f32 %v441_v30, %v429_v45 }
 0x238   :  { %v460_v50 = vadd.f32 %v459_v46, %v458_v42  ;;  %v489_v30 = vrot.slane %v488_v47, 4 }
 0x23a   :  { %v461_v51 = vrot.slane %v460_v50, 2  ;;  %v490_v36 = vadd.f32 %v489_v30, %v488_v47 }
 0x23b   :  { %v434_v53 = vpop.f32.mrb[8].mxu1 }
 0x23c   :  { %v462_v54 = vadd.f32 %v461_v51, %v460_v50  ;;  %v499_v56 = vadd.f32 %v434_v53, %v429_v45  ;;  %v527_v57 = vmul.f32 %v442_v31, %v434_v53  ;;  %v626_v58 = vpop.f32.mrb[9].mxu1  ;;  %v491_v41 = vrot.slane %v490_v36, 2 }
 0x23d   :  { %v437_v59 = vpop.f32.mrb[10].mxu1 }
 0x23e   :  { %v463_v60 = vrot.slane %v462_v54, 1  ;;  %v529_v61 = vadd.f32 %v527_v57, %v526_v55  ;;  %v500_v62 = vadd.f32 %v499_v56, %v437_v59  ;;  %v627_v63 = vpop.f32.mrb[11].mxu1  ;;  %v528_v0 = vmul.f32 %v443_v39, %v437_v59 }
 0x23f   :  { %v492_v46 = vadd.f32 %v491_v41, %v490_v36 }
 0x240   :  { %v464_v2 = vadd.f32 %v463_v60, %v462_v54  ;;  %v501_v3 = vrot.slane %v500_v62, 4  ;;  %v530_v4 = vadd.f32 %v529_v61, %v528_v0 }
 0x241   :  { %v493_v51 = vrot.slane %v492_v46, 1 }
 0x242   :  { %v465_v5 = vmul.f32 0.05882353, %v464_v2  ;;  %v502_v6 = vadd.f32 %v501_v3, %v500_v62  ;;  %v531_v44 = vrot.slane %v530_v4, 4 }
 0x243   :  { %v494_v55 = vadd.f32 %v493_v51, %v492_v46 }
 0x244   :  { %v466_v8 = vsub.f32 %v418_v29, %v465_v5  ;;  %v467_v9 = vsub.f32 %v421_v33, %v465_v5  ;;  %v468_v10 = vsub.f32 %v426_v40, %v465_v5  ;;  %v503_v11 = vrot.slane %v502_v6, 2 }
 0x245   :  { %v532_v49 = vadd.f32 %v531_v44, %v530_v4 }
 0x246   :  { %v471_v12 = vmul.f32 %v588_v7, %v468_v10  ;;  %v472_v13 = vmul.f32 %v466_v8, %v466_v8  ;;  %v473_v14 = vmul.f32 %v467_v9, %v467_v9  ;;  %v504_v15 = vadd.f32 %v503_v11, %v502_v6 }
 0x248   :  { %v474_v16 = vmul.f32 %v471_v12, %v471_v12  ;;  %v475_v17 = vadd.f32 %v473_v14, %v472_v13  ;;  %v505_v18 = vrot.slane %v504_v15, 1 }
 0x24a   :  { %v476_v19 = vadd.f32 %v475_v17, %v474_v16  ;;  %v506_v20 = vadd.f32 %v505_v18, %v504_v15 }
 0x24c   :  { %v477_v21 = vrot.slane %v476_v19, 4  ;;  %v507_v22 = vmul.f32 0.05882353, %v506_v20 }
 0x24e   :  { %v478_v23 = vadd.f32 %v477_v21, %v476_v19  ;;  %v508_v24 = vsub.f32 %v429_v45, %v507_v22  ;;  %v509_v25 = vsub.f32 %v434_v53, %v507_v22  ;;  %v510_v26 = vsub.f32 %v437_v59, %v507_v22 }
 0x24f   :  { %v533_v53 = vrot.slane %v532_v49, 2 }
 0x250   :  { %v479_v1 = vrot.slane %v478_v23, 2  ;;  %v513_v27 = vmul.f32 %v588_v7, %v510_v26  ;;  %v514_v28 = vmul.f32 %v508_v24, %v508_v24  ;;  %v515_v29 = vmul.f32 %v509_v25, %v509_v25 }
 0x251   :  { %v534_v56 = vadd.f32 %v533_v53, %v532_v49 }
 0x252   :  { %v480_v31 = vadd.f32 %v479_v1, %v478_v23  ;;  %v516_v32 = vmul.f32 %v513_v27, %v513_v27  ;;  %v517_v33 = vadd.f32 %v515_v29, %v514_v28 }
 0x253   :  { %v535_v58 = vrot.slane %v534_v56, 1 }
 0x254   :  { %v481_v34 = vrot.slane %v480_v31, 1  ;;  %v518_v35 = vadd.f32 %v517_v33, %v516_v32 }
 0x255   :  { %v536_v59 = vadd.f32 %v535_v58, %v534_v56 }
 0x256   :  { %v482_v37 = vadd.f32 %v481_v34, %v480_v31  ;;  %v519_v38 = vrot.slane %v518_v35, 4 }
 0x258   :  { %v483_v39 = vmul.f32 0.05882353, %v482_v37  ;;  %v520_v40 = vadd.f32 %v519_v38, %v518_v35 }
 0x25a   :  { %v495_v42 = vadd.f32 1e-05, %v483_v39  ;;  %v521_v43 = vrot.slane %v520_v40, 2 }
 0x25c   :  { %689 = vrsqrt.f32 %v495_v42  ;;  %v522_v45 = vadd.f32 %v521_v43, %v520_v40 }
 0x25e   :  { %v523_v48 = vrot.slane %v522_v45, 1 }
 0x260   :  { %v524_v50 = vadd.f32 %v523_v48, %v522_v45 }
 0x262   :  { %v525_v52 = vmul.f32 0.05882353, %v524_v50 }
 0x264   :  { %v537_v54 = vadd.f32 1e-05, %v525_v52 }
 0x266   :  { %v690_v47 = vpop.eup %689  ;;  %691 = vrsqrt.f32 %v537_v54 }
 0x267   :  { %v497_v57 = vmul.f32 %v690_v47, %v494_v55 }
 0x269   :  { %498 = vst [vmem:[#allocation10] sm:$0x1] %v497_v57 }
 0x270   :  { %v692_v60 = vpop.eup %691 }
 0x271   :  { %v539_v61 = vmul.f32 %v692_v60, %v536_v59 }
 0x273   :  { %541 = vst [vmem:[#allocation10 + $0x1] sm:$0x1] %v539_v61 }
 0x274   :  { %792 = shalt.err (!%p789_p8)
}
 0x275   :  { %s793_s15 = scalar_lea.hbm %s942_s4, 32 }
 0x276   :  { %p794_p9 = scmp.ne.s32.totalorder %s942_s4, %s793_s15  ;;  %p797_p10 = scmp.lt.u32.totalorder %s793_s15, %s942_s4 }
 0x278   :  { %p799_p11 = pnand %p797_p10, %p794_p9 }
 0x27a   :  { %802 = shalt.err (!%p799_p11)
}
 0x27b   :  { %s823_s20 = smov 16   ;;  %s824_s21 = smov 1  }
 0x27c   :  { %553 = dma.vmem_to_hbm [thread:$0]  %s548_s25, 32, %s942_s4, [#allocation4], %s823_s20, %s823_s20, %s824_s21  }
 0x27d   :  { %809 = dma.done.wait [#allocation4], 32  }
 0x27e   :  { %810 = vsyncadd [#allocation4], 4294967264 }
 0x27f   :  { %557 = vsyncpa [#allocation3], 1 }
 0x280   :  { %558 = vsyncpa [#allocation6], 1 }
 0x281   :  { %559 = vsyncpa [#allocation9], 1 }
 0x282   :  { %560 = vsyncpa [#allocation4], 1 }

</bundles_post_ra>
